<compile_context>
chip_gen: v7x
topology: tpu7x:2x2x1
jax: 0.10.0
libtpu: 0.0.40
codegen_flags: <defaults>
</compile_context>

<pallas_src>
import functools

import jax
import jax.numpy as jnp
from jax.experimental import pallas as pl
from jax.experimental.pallas import tpu as pltpu


def _round_up(x: int, m: int) -> int:
    return ((x + m - 1) // m) * m


def _cdiv(a: int, b: int) -> int:
    return (a + b - 1) // b


def encoder_kernel(x_ref, w1_ref, b1_ref, w2_ref, b2_ref, o_ref):
    # x_ref:  (TB, input)       f32  (cast to bf16 in-kernel; no wrapper round trip)
    # w1_ref: (input, hidden)   bf16 (pre-transposed once -> native K-major MXU feed)
    # b1_ref: (1, hidden)       f32
    # w2_ref: (hidden, latent)  f32  (tiny; f32 keeps the 2nd layer exact)
    # b2_ref: (1, latent)       f32
    # o_ref:  (TB, latent)      f32
    x = x_ref[...].astype(jnp.bfloat16)                  # VPU cast, hidden under matmul
    h = jnp.dot(x, w1_ref[...], preferred_element_type=jnp.float32)   # (TB, hidden) f32
    h = h + b1_ref[...]                                  # f32 bias add (VPU)
    z = jnp.dot(h, w2_ref[...], preferred_element_type=jnp.float32)   # (TB, latent) f32
    z = z + b2_ref[...]
    o_ref[...] = jax.nn.sigmoid(z).astype(o_ref.dtype)   # logistic on EUP


@functools.partial(jax.jit, static_argnames=("tb_max",))
def encoder_forward(x, w1, b1, w2, b2, *, tb_max=1024):
    """x: (B, input); w1: (hidden, input); b1: (hidden,);
       w2: (latent, hidden); b2: (latent,).  Mirrors PyTorch nn.Linear params."""
    B, input_size = x.shape
    hidden = w1.shape[0]
    latent = w2.shape[0]

    # ---- tile selection ----
    # Fewer, bigger tiles amortize the ~0.35 us/grid-step overhead; balance the
    # tile size so padding is < 8 rows, and keep >= 2 tiles when B permits so
    # the "parallel" batch axis shards across both TensorCores on v7x.
    n_tiles = _cdiv(B, tb_max)
    if B >= 16:
        n_tiles = max(n_tiles, 2)
    tb = _round_up(_cdiv(B, n_tiles), 8)
    B_pad = n_tiles * tb
    x_in = jnp.pad(x, ((0, B_pad - B), (0, 0))) if B_pad != B else x

    # ---- parameter prep (one-time, tiny) ----
    # Pre-transpose weights to K-major so the kernel never transposes a
    # resident tile inside the grid loop.
    w1_t = w1.T.astype(jnp.bfloat16)          # (input, hidden)
    w2_t = w2.T.astype(jnp.float32)           # (hidden, latent)  -- kept f32
    b1_r = b1.reshape(1, hidden).astype(jnp.float32)
    b2_r = b2.reshape(1, latent).astype(jnp.float32)

    # ---- VMEM budget (generation-aware cap) ----
    per_step = tb * input_size * 4 + tb * latent * 4          # x tile + out tile
    resident = (input_size * hidden * 2 + hidden * latent * 4
                + (hidden + latent) * 4)
    want = 2 * (2 * per_step) + 2 * resident + (1 << 20)      # double-buffered
    try:
        vmem_cap = int(pltpu.get_tpu_info().vmem_capacity_bytes)
    except Exception:
        vmem_cap = 64 << 20                                   # conservative (v7x)
    vmem_limit = int(min(max(want, 16 << 20), int(vmem_cap * 0.6)))

    cost = pl.CostEstimate(
        flops=2 * B_pad * (input_size * hidden + hidden * latent),
        transcendentals=B_pad * latent,
        bytes_accessed=(x_in.size * 4 + w1_t.size * 2 + w2_t.size * 4
                        + b1_r.size * 4 + b2_r.size * 4 + B_pad * latent * 4),
    )

    out = pl.pallas_call(
        encoder_kernel,
        out_shape=jax.ShapeDtypeStruct((B_pad, latent), jnp.float32),
        grid=(n_tiles,),
        in_specs=[
            pl.BlockSpec((tb, input_size), lambda i: (i, 0)),      # x: tiled over B
            pl.BlockSpec((input_size, hidden), lambda i: (0, 0)),  # W1^T: resident
            pl.BlockSpec((1, hidden), lambda i: (0, 0)),           # b1: resident
            pl.BlockSpec((hidden, latent), lambda i: (0, 0)),      # W2^T: resident
            pl.BlockSpec((1, latent), lambda i: (0, 0)),           # b2: resident
        ],
        out_specs=pl.BlockSpec((tb, latent), lambda i: (i, 0)),
        compiler_params=pltpu.CompilerParams(
            dimension_semantics=("parallel",),   # batch tiles shard across TCs (v7x)
            vmem_limit_bytes=vmem_limit,
        ),
        cost_estimate=cost,
    )(x_in, w1_t, b1_r, w2_t, b2_r)

    return out[:B] if B_pad != B else out


def reference_forward(x, w1, b1, w2, b2):
    h = x @ w1.T + b1
    return jax.nn.sigmoid(h @ w2.T + b2)


if __name__ == "__main__":
    # Small shapes consistent with the module's forward; B=64 exercises the
    # multi-tile (>=2 grid steps) path.
    B, input_size, hidden_size, latent_size = 64, 32, 64, 16

    key = jax.random.PRNGKey(0)
    kx, kw1, kb1, kw2, kb2 = jax.random.split(key, 5)

    x = jax.random.normal(kx, (B, input_size), dtype=jnp.float32)
    # Deterministic synthetic parameters (match nn.Linear shapes: (out, in)).
    w1 = jax.random.normal(kw1, (hidden_size, input_size), dtype=jnp.float32) * 0.1
    b1 = jax.random.normal(kb1, (hidden_size,), dtype=jnp.float32) * 0.1
    w2 = jax.random.normal(kw2, (latent_size, hidden_size), dtype=jnp.float32) * 0.1
    b2 = jax.random.normal(kb2, (latent_size,), dtype=jnp.float32) * 0.1

    out = encoder_forward(x, w1, b1, w2, b2)
    jax.block_until_ready(out)

    ref = reference_forward(x, w1, b1, w2, b2)
    assert out.shape == (B, latent_size)
    # bf16 first-layer MXU inputs with f32 accumulation (2nd layer fully f32)
    # -> mildly relaxed tolerance vs the f32 reference.
    assert jnp.allclose(out, ref, atol=2e-2, rtol=2e-2), "mismatch vs reference"

    print("KERNEL_OK")
</pallas_src>

<mosaic_0001>
module attributes {stable_mosaic.version = 11 : i64} {
  func.func @encoder_kernel(%arg0: i32, %arg1: memref<32x32xf32, #tpu.memory_space<vmem>>, %arg2: memref<32x64xbf16, #tpu.memory_space<vmem>>, %arg3: memref<1x64xf32, #tpu.memory_space<vmem>>, %arg4: memref<64x16xf32, #tpu.memory_space<vmem>>, %arg5: memref<1x16xf32, #tpu.memory_space<vmem>>, %arg6: memref<32x16xf32, #tpu.memory_space<vmem>>) attributes {dimension_semantics = [#tpu.dimension_semantics<parallel>], iteration_bounds = array<i64: 2>, scalar_prefetch = 0 : i64, scratch_operands = 0 : i64, tpu.core_type = #tpu.core_type<tc>, window_params = [{transform_indices = @transform_0, window_bounds = array<i64: 32, 32>}, {pipeline_mode = #tpu.pipeline_mode<synchronous>, transform_indices = @transform_1, window_bounds = array<i64: 32, 64>}, {pipeline_mode = #tpu.pipeline_mode<synchronous>, transform_indices = @transform_2, window_bounds = array<i64: 1, 64>}, {pipeline_mode = #tpu.pipeline_mode<synchronous>, transform_indices = @transform_3, window_bounds = array<i64: 64, 16>}, {pipeline_mode = #tpu.pipeline_mode<synchronous>, transform_indices = @transform_4, window_bounds = array<i64: 1, 16>}, {transform_indices = @transform_5, window_bounds = array<i64: 32, 16>}]} {
    %c0 = arith.constant 0 : index
    %c0_0 = arith.constant 0 : index
    %0 = vector.load %arg1[%c0, %c0_0] : memref<32x32xf32, #tpu.memory_space<vmem>>, vector<32x32xf32>
    %1 = arith.truncf %0 : vector<32x32xf32> to vector<32x32xbf16>
    %c0_1 = arith.constant 0 : index
    %c0_2 = arith.constant 0 : index
    %2 = vector.load %arg2[%c0_1, %c0_2] : memref<32x64xbf16, #tpu.memory_space<vmem>>, vector<32x64xbf16>
    %cst = arith.constant dense<0.000000e+00> : vector<32x64xf32>
    %3 = tpu.matmul %1, %2, %cst {dimension_numbers = #tpu.dot_dimension_numbers<[1], [0], [0], [1], [0, 0, 1, 1], [], []>} : vector<32x32xbf16>, vector<32x64xbf16>, vector<32x64xf32> -> vector<32x64xf32>
    %c0_3 = arith.constant 0 : index
    %c0_4 = arith.constant 0 : index
    %4 = vector.load %arg3[%c0_3, %c0_4] : memref<1x64xf32, #tpu.memory_space<vmem>>, vector<1x64xf32>
    %5 = vector.broadcast %4 : vector<1x64xf32> to vector<32x64xf32>
    %6 = arith.addf %3, %5 : vector<32x64xf32>
    %c0_5 = arith.constant 0 : index
    %c0_6 = arith.constant 0 : index
    %7 = vector.load %arg4[%c0_5, %c0_6] : memref<64x16xf32, #tpu.memory_space<vmem>>, vector<64x16xf32>
    %cst_7 = arith.constant dense<0.000000e+00> : vector<32x16xf32>
    %8 = tpu.matmul %6, %7, %cst_7 {dimension_numbers = #tpu.dot_dimension_numbers<[1], [0], [0], [1], [0, 0, 1, 1], [], []>} : vector<32x64xf32>, vector<64x16xf32>, vector<32x16xf32> -> vector<32x16xf32>
    %c0_8 = arith.constant 0 : index
    %c0_9 = arith.constant 0 : index
    %9 = vector.load %arg5[%c0_8, %c0_9] : memref<1x16xf32, #tpu.memory_space<vmem>>, vector<1x16xf32>
    %10 = vector.broadcast %9 : vector<1x16xf32> to vector<32x16xf32>
    %11 = arith.addf %8, %10 : vector<32x16xf32>
    %12 = arith.negf %11 : vector<32x16xf32>
    %13 = math.exp %12 : vector<32x16xf32>
    %cst_10 = arith.constant 1.000000e+00 : f32
    %14 = vector.broadcast %cst_10 : f32 to vector<32x16xf32>
    %15 = arith.addf %14, %13 : vector<32x16xf32>
    %16 = arith.divf %14, %15 : vector<32x16xf32>
    %c0_11 = arith.constant 0 : index
    %c0_12 = arith.constant 0 : index
    %17 = vector.load %arg6[%c0_11, %c0_12] : memref<32x16xf32, #tpu.memory_space<vmem>>, vector<32x16xf32>
    tpu.vector_store %arg6[%c0_11, %c0_12], %16 {strides = array<i32>} : memref<32x16xf32, #tpu.memory_space<vmem>>, vector<32x16xf32>,
    return
  }
  func.func @transform_0(%arg0: i32) -> (i32, i32) {
    %c0_i32 = arith.constant 0 : i32
    %c0_i32_0 = arith.constant 0 : i32
    return %arg0, %c0_i32 : i32, i32
  }
  func.func @transform_1(%arg0: i32) -> (i32, i32) {
    %c0_i32 = arith.constant 0 : i32
    %c0_i32_0 = arith.constant 0 : i32
    %c0_i32_1 = arith.constant 0 : i32
    return %c0_i32, %c0_i32_0 : i32, i32
  }
  func.func @transform_2(%arg0: i32) -> (i32, i32) {
    %c0_i32 = arith.constant 0 : i32
    %c0_i32_0 = arith.constant 0 : i32
    %c0_i32_1 = arith.constant 0 : i32
    return %c0_i32, %c0_i32_0 : i32, i32
  }
  func.func @transform_3(%arg0: i32) -> (i32, i32) {
    %c0_i32 = arith.constant 0 : i32
    %c0_i32_0 = arith.constant 0 : i32
    %c0_i32_1 = arith.constant 0 : i32
    return %c0_i32, %c0_i32_0 : i32, i32
  }
  func.func @transform_4(%arg0: i32) -> (i32, i32) {
    %c0_i32 = arith.constant 0 : i32
    %c0_i32_0 = arith.constant 0 : i32
    %c0_i32_1 = arith.constant 0 : i32
    return %c0_i32, %c0_i32_0 : i32, i32
  }
  func.func @transform_5(%arg0: i32) -> (i32, i32) {
    %c0_i32 = arith.constant 0 : i32
    %c0_i32_0 = arith.constant 0 : i32
    return %arg0, %c0_i32 : i32, i32
  }
}

</mosaic_0001>

<bundles_post_ra>
// kernel: encoder_forward.1
= control target key start
LH: loop header
LB: loop body
LE: loop exit
PB: predicated region body
PF: predicated region fallthrough
CT: control target
= control target key end

     0   :  { %s663_s18 = smov 0   ;;  %s723_s0 = inlined_call_operand.vmem [shape: f32[64,32], index: 0, kind: input, shape index: {}]   ;;  %s724_s1 = inlined_call_operand.vmem [shape: bf16[32,64], index: 1, kind: input, shape index: {}]   ;;  %s725_s2 = inlined_call_operand.vmem [shape: f32[1,64], index: 2, kind: input, shape index: {}]   ;;  %s726_s3 = inlined_call_operand.vmem [shape: f32[64,16], index: 3, kind: input, shape index: {}]   ;;  %s727_s4 = inlined_call_operand.vmem [shape: f32[1,16], index: 4, kind: input, shape index: {}]   ;;  %s728_s5 = inlined_call_operand.vmem [shape: f32[64,16], index: 5, kind: output, shape index: {}]  }
   0x1 LB: > { %s512_s19 = sadd.s32 4294967295, %s631_s18   ;;  %p516_p0 = scmp.ge.s32.totalorder %s631_s18, 1  ;;  %s631_s18 = sphi %s663_s18, %s15_s18  }
   0x2   : > { %p188_p1 = scmp.lt.s32.totalorder %s631_s18, 3 }
   0x4   : > { %p189_p2 = pnand %p516_p0, %p188_p1 }
   0x5   : > { %v607_v0 = vld [vmem:[%s724_s1] sm:$0xff] (!%p189_p2)   ;;  %s517_s22 = sshll.u32 (!%p189_p2), %s512_s19, 2  ;;  %v608_v1 = vld [vmem:[%s724_s1 + $0x8] sm:$0xff] (!%p189_p2)   ;;  %v316_v4 = vld [vmem:[%s726_s3 + $0x10] sm:$0xff] (!%p189_p2)  ;;  %vm258_vm0 = vcmask (!%p189_p2), 261120   ;;  %vm329_vm1 = vcmask (!%p189_p2), 523264  }
   0x6   : > { %192 = sbr.rel (%p189_p2) target bundleno = 484 (0x1e4), region = 40  ;;  %p217_p3 = scmp.lt.s32.totalorder (!%p189_p2), %s517_s22, 7  ;;  %553 = vmatprep.subr.bf16.mxu0 (!%p189_p2), %v607_v0  ;;  %v314_v2 = vld [vmem:[%s726_s3] sm:$0xff] (!%p189_p2)  ;;  %v315_v3 = vld [vmem:[%s726_s3 + $0x8] sm:$0xff] (!%p189_p2)  ;;  %v317_v6 = vld [vmem:[%s726_s3 + $0x18] sm:$0xff] (!%p189_p2)  ;;  %vm451_vm2 = vcmask (!%p189_p2), 130048  }
   0x7   : > { %554 = vmatpush3.bf16.msra.mxu0 (!%p189_p2), %v607_v0  ;;  %v583_v5 = vpack.c.bf16 (!%p189_p2), %v315_v3, %v314_v2  ;;  %v587_v7 = vpack.c.bf16 (!%p189_p2), %v317_v6, %v316_v4  ;;  %v318_v8 = vld [vmem:[%s726_s3 + $0x20] sm:$0xff] (!%p189_p2)  ;;  %v319_v9 = vld [vmem:[%s726_s3 + $0x28] sm:$0xff] (!%p189_p2)  ;;  %v320_v17 = vld [vmem:[%s726_s3 + $0x30] sm:$0xff] (!%p189_p2) }
   0x8   : > { %555 = vmatprep.subr.bf16.mxu0 (!%p189_p2), %v608_v1  ;;  %v591_v13 = vpack.c.bf16 (!%p189_p2), %v319_v9, %v318_v8  ;;  %v321_v18 = vld [vmem:[%s726_s3 + $0x38] sm:$0xff] (!%p189_p2)  ;;  %v521_v20 = vld [vmem:[%s725_s2] ss:$0 sm:$0xff] (!%p189_p2) }
   0x9   : > { %584 = vmatprep.subr.bf16.mxu1 (!%p189_p2), %v583_v5  ;;  %v595_v19 = vpack.c.bf16 (!%p189_p2), %v321_v18, %v320_v17  ;;  %v526_v29 = vld [vmem:[%s727_s4] ss:$0 sm:$0xff] (!%p189_p2) }
   0xa   : > { %586 = vmatpush3.bf16.msra.mxu1 (!%p189_p2), %v583_v5 }
   0xb   : > { %556 = vmatpush3.bf16.msra.mxu0 (!%p189_p2), %v608_v1  ;;  %588 = vmatprep.subr.bf16.mxu1 (!%p189_p2), %v587_v7 }
   0xd   : > { %s730_s22 = smov (!%p217_p3, %s517_s22), 7 }
   0xe   : > { %s518_s12 = sshll.u32 %s730_s22, 3  ;;  %590 = vmatpush3.bf16.msra.mxu1 %v587_v7 }
   0xf   : > { %s220_s15 = scalar_lea.vmem %s723_s0, %s518_s12  ;;  %592 = vmatprep.subr.bf16.mxu1 %v591_v13  ;;  %s226_s28 = scalar_lea.vmem %s728_s5, %s518_s12 }
  0x10   : > { %v229_v10 = vld [vmem:[%s220_s15] sm:$0xff]  ;;  %v230_v11 = vld [vmem:[%s220_s15 + $0x8] sm:$0xff]  ;;  %v231_v12 = vld [vmem:[%s220_s15 + $0x10] sm:$0xff] }
  0x11   : > { %v233_v14 = vpack.c.bf16 %v230_v11, %v229_v10  ;;  %v232_v15 = vld [vmem:[%s220_s15 + $0x18] sm:$0xff] }
  0x12   : > { %v234_v16 = vpack.c.bf16 %v232_v15, %v231_v12  ;;  %594 = vmatpush3.bf16.msra.mxu1 %v591_v13 }
  0x13   : > { %557 = vmatprep.mubr.msk.bf16.mxu0 %vm258_vm0, %v233_v14  ;;  %596 = vmatprep.subr.bf16.mxu1 %v595_v19 }
  0x14   : > { %558 = vmatmul.mubr.msk.bf16.vlgmr.msra.gmra.mrb[0].mxu0 %vm258_vm0, %v234_v16 }
  0x16   : > { %598 = vmatpush3.bf16.msra.mxu1 %v595_v19 }
  0xe7   : > { %v559_v21 = vpop.f32.mrb[0].mxu0 }
  0xe8   : > { %v299_v22 = vpop.f32.mrb[1].mxu0  ;;  %v308_v27 = vadd.f32 %v559_v21, %v521_v20 }
  0xe9   : > { %v300_v23 = vadd.f32 %v521_v20, %v299_v22  ;;  %v560_v24 = vpop.f32.mrb[2].mxu0 }
  0xea   : > { %v302_v25 = vpop.f32.mrb[3].mxu0  ;;  %v311_v28 = vadd.f32 %v560_v24, %v521_v20 }
  0xeb   : > { %v303_v26 = vadd.f32 %v521_v20, %v302_v25  ;;  %577 = vmatprep.mubr.msk.f32.mxu1 %vm329_vm1, %v300_v23 }
  0xed   : > { %578 = vmatmul.mubr.msk.f32.vlgmr.msra.gmra.mrb[0].mxu1 %vm329_vm1, %v303_v26 }
  0xee   : > { %580 = vmatprep.mubr.msk.f32.mxu1 %vm329_vm1, %v308_v27 }
  0xf1   : > { %581 = vmatmul.mubr.msk.f32.gmra.mrb[2].mxu1 %vm329_vm1, %v311_v28 }
 0x1c0   : > { %v579_v30 = vpop.f32.mrb[0].mxu1 }
 0x1c1   : > { %v414_v31 = vadd.f32 %v579_v30, %v526_v29  ;;  %v408_v32 = vpop.f32.mrb[1].mxu1 }
 0x1c2   : > { %v409_v33 = vadd.f32 %v526_v29, %v408_v32 }
 0x1c3   : > { %v532_v34 = vmul.f32 -1.442695, %v414_v31 }
 0x1c4   : > { %v531_v35 = vmul.f32 -1.442695, %v409_v33  ;;  %v582_v36 = vpop.f32.mrb[2].mxu1 }
 0x1c5   : > { %609 = vpow2.f32 %v532_v34  ;;  %v424_v37 = vadd.f32 %v582_v36, %v526_v29  ;;  %v418_v38 = vpop.f32.mrb[3].mxu1 }
 0x1c6   : > { %611 = vpow2.f32 %v531_v35  ;;  %v419_v39 = vadd.f32 %v526_v29, %v418_v38 }
 0x1c7   : > { %v534_v40 = vmul.f32 -1.442695, %v424_v37 }
 0x1c8   : > { %v533_v41 = vmul.f32 -1.442695, %v419_v39 }
 0x1c9   : > { %613 = vpow2.f32 %v534_v40 }
 0x1ca   : > { %615 = vpow2.f32 %v533_v41 }
 0x1cf   : > { %v610_v42 = vpop.eup %609 }
 0x1d0   : > { %v612_v43 = vpop.eup %611  ;;  %v440_v44 = vadd.f32 1.0, %v610_v42 }
 0x1d1   : > { %v439_v45 = vadd.f32 1.0, %v612_v43 }
 0x1d3   : > { %v614_v46 = vpop.eup %613  ;;  %617 = vrcp.f32 %v439_v45 }
 0x1d4   : > { %v616_v47 = vpop.eup %615  ;;  %619 = vrcp.f32 %v440_v44  ;;  %v442_v48 = vadd.f32 1.0, %v614_v46 }
 0x1d5   : > { %v441_v49 = vadd.f32 1.0, %v616_v47 }
 0x1d7   : > { %621 = vrcp.f32 %v441_v49 }
 0x1d8   : > { %623 = vrcp.f32 %v442_v48 }
 0x1dd   : > { %v618_v50 = vpop.eup %617 }
 0x1de   : > { %v620_v51 = vpop.eup %619  ;;  %452 = vst.msk [vmem:[%s226_s28] sm:$0xff] %vm451_vm2, %v618_v50 }
 0x1df   : > { %453 = vst.msk [vmem:[%s226_s28 + $0x8] sm:$0xff] %vm451_vm2, %v620_v51 }
 0x1e1   : > { %v622_v52 = vpop.eup %621 }
 0x1e2   : > { %v624_v53 = vpop.eup %623  ;;  %454 = vst.msk [vmem:[%s226_s28 + $0x10] sm:$0xff] %vm451_vm2, %v622_v52 }
 0x1e3   : > { %455 = vst.msk [vmem:[%s226_s28 + $0x18] sm:$0xff] %vm451_vm2, %v624_v53 }
 0x1e4 PF: > { %s15_s18 = sadd.s32 1, %s631_s18  }
 0x1e5   : > { %p12_p4 = scmp.ge.s32.totalorder %s15_s18, 4  }
 0x1e7   :  { %14 = sbr.rel (!%p12_p4) target bundleno = 1 (0x1), region = 70 }

</bundles_post_ra>
